<compile_context>
chip_gen: v5e
topology: v5e:2x2
jax: 0.10.0
libtpu: 0.0.40
codegen_flags: <defaults>
</compile_context>

<pallas_src>
import jax
import jax.numpy as jnp
from jax.experimental import pallas as pl
from jax.experimental.pallas import tpu as pltpu

NUM_CLASSES = 10
IN_FEAT = 4 * 4
H1 = 40
H2 = 20
BN_EPS = 1e-5

# Packed-parameter layout (row offsets are multiples of 8 so the static
# sublane slices in the kernel are cheap).
_W1_ROW = 0                     # (IN_FEAT, H1) = (16, 40)
_W2_ROW = 16                    # (H1, H2)      = (40, 20)
_W3_ROW = 56                    # (H2, NC)      = (20, 10)
_WPACK_ROWS = 80                # 16 + 40 + 20 = 76 -> padded to 80
_WPACK_COLS = H1                # max(H1, H2, NUM_CLASSES) = 40
_BPACK_ROWS = 8                 # row 0 = b1, row 1 = b2, row 2 = b3


def _round_up(n, m):
    return ((n + m - 1) // m) * m


def _mlp_kernel(x_ref, w_ref, b_ref, o_ref):
    # x_ref: (TB, IN_FEAT) float32 in the natural batch-major layout.
    x = x_ref[...].astype(jnp.bfloat16)

    # Static views into the packed, VMEM-resident parameter blocks.
    w1 = w_ref[_W1_ROW:_W1_ROW + IN_FEAT, :H1]          # (16, 40) bf16
    w2 = w_ref[_W2_ROW:_W2_ROW + H1, :H2]               # (40, 20) bf16
    w3 = w_ref[_W3_ROW:_W3_ROW + H2, :NUM_CLASSES]      # (20, 10) bf16
    b1 = b_ref[0:1, :H1]                                 # (1, 40) f32
    b2 = b_ref[1:2, :H2]                                 # (1, 20) f32
    b3 = b_ref[2:3, :NUM_CLASSES]                        # (1, 10) f32

    # fc1 (BN1 folded in) + ReLU.  Dropout: inference -> identity.
    h = jnp.dot(x, w1, preferred_element_type=jnp.float32) + b1
    h = jnp.maximum(h, 0.0).astype(jnp.bfloat16)         # (TB, 40)

    # fc2 (BN2 folded in) + ReLU.
    h = jnp.dot(h, w2, preferred_element_type=jnp.float32) + b2
    h = jnp.maximum(h, 0.0).astype(jnp.bfloat16)         # (TB, 20)

    # fc3 + softmax over the class axis (last dim); exact normalization.
    logits = jnp.dot(h, w3, preferred_element_type=jnp.float32) + b3   # (TB, 10)
    logits = logits - jnp.max(logits, axis=-1, keepdims=True)
    e = jnp.exp(logits)
    probs = e / jnp.sum(e, axis=-1, keepdims=True)
    o_ref[...] = probs.astype(o_ref.dtype)


def _pack_params(params):
    """Fold eval-mode BatchNorm into the linear layers and pack into two blocks.

    Returns (wpack bf16 (80, 40), bpack f32 (8, 40)).  Mathematically identical
    to fc -> BN(eval) in the PyTorch module (weights quantized to bf16).
    """
    s1 = params["g1"] * jax.lax.rsqrt(params["v1"] + BN_EPS)           # (1, H1)
    w1 = params["w1"] * s1                                             # (16, H1)
    b1 = (params["b1"] - params["m1"]) * s1 + params["be1"]            # (1, H1)
    s2 = params["g2"] * jax.lax.rsqrt(params["v2"] + BN_EPS)           # (1, H2)
    w2 = params["w2"] * s2                                             # (H1, H2)
    b2 = (params["b2"] - params["m2"]) * s2 + params["be2"]            # (1, H2)
    w3 = params["w3"]                                                  # (H2, NC)
    b3 = params["b3"]                                                  # (1, NC)

    wpack = jnp.zeros((_WPACK_ROWS, _WPACK_COLS), jnp.float32)
    wpack = wpack.at[_W1_ROW:_W1_ROW + IN_FEAT, :H1].set(w1)
    wpack = wpack.at[_W2_ROW:_W2_ROW + H1, :H2].set(w2)
    wpack = wpack.at[_W3_ROW:_W3_ROW + H2, :NUM_CLASSES].set(w3)
    wpack = wpack.astype(jnp.bfloat16)                                 # bf16 MXU path

    bpack = jnp.zeros((_BPACK_ROWS, _WPACK_COLS), jnp.float32)
    bpack = bpack.at[0:1, :H1].set(b1)
    bpack = bpack.at[1:2, :H2].set(b2)
    bpack = bpack.at[2:3, :NUM_CLASSES].set(b3)
    return wpack, bpack


def simple_mlp_forward(x_nchw, params, *, batch_tile=4096, out_dtype=jnp.float32):
    """x_nchw: (B, 1, 4, 4) float32 (PyTorch NCHW). Returns (B, NUM_CLASSES).

    batch_tile: samples per grid step.  Default 4096 fits every generation's
    default scoped-VMEM budget; on v7x prefer 16384 (with B large enough for
    >= 2 grid steps so the 'parallel' axis shards across both TensorCores).
    """
    B = x_nchw.shape[0]
    x_flat = x_nchw.reshape(B, IN_FEAT)          # contiguous reshape: no HBM pass

    # Batch maps to the sublane axis of the x / output blocks -> multiple of 8.
    TB = min(batch_tile, _round_up(B, 8))
    TB = _round_up(TB, 8)
    B_pad = _round_up(B, TB)
    if B_pad != B:
        x_flat = jnp.pad(x_flat, ((0, B_pad - B), (0, 0)))

    wpack, bpack = _pack_params(params)

    const = lambda i: (0, 0)                      # params resident across the grid
    cost = pl.CostEstimate(
        flops=2 * B_pad * (IN_FEAT * H1 + H1 * H2 + H2 * NUM_CLASSES),
        transcendentals=B_pad * NUM_CLASSES,
        bytes_accessed=(x_flat.size * x_flat.dtype.itemsize
                        + B_pad * NUM_CLASSES * jnp.dtype(out_dtype).itemsize
                        + wpack.size * wpack.dtype.itemsize
                        + bpack.size * bpack.dtype.itemsize),
    )

    out = pl.pallas_call(
        _mlp_kernel,
        out_shape=jax.ShapeDtypeStruct((B_pad, NUM_CLASSES), out_dtype),
        grid=(B_pad // TB,),
        in_specs=[
            pl.BlockSpec((TB, IN_FEAT), lambda i: (i, 0)),
            pl.BlockSpec((_WPACK_ROWS, _WPACK_COLS), const),
            pl.BlockSpec((_BPACK_ROWS, _WPACK_COLS), const),
        ],
        out_specs=pl.BlockSpec((TB, NUM_CLASSES), lambda i: (i, 0)),
        compiler_params=pltpu.CompilerParams(
            dimension_semantics=("parallel",),
            vmem_limit_bytes=48 * 1024 * 1024,    # headroom for 4K-sample tiles
        ),
        cost_estimate=cost,
    )(x_flat, wpack, bpack)

    return out if B_pad == B else out[:B]


def simple_mlp_reference(x_nchw, params):
    """Pure-JAX f32 reference with the original (unfolded) fc -> BN(eval) -> ReLU math."""
    x = x_nchw.reshape(x_nchw.shape[0], -1)
    h = x @ params["w1"] + params["b1"]
    h = (h - params["m1"]) * jax.lax.rsqrt(params["v1"] + BN_EPS)
    h = h * params["g1"] + params["be1"]
    h = jnp.maximum(h, 0.0)
    h = h @ params["w2"] + params["b2"]
    h = (h - params["m2"]) * jax.lax.rsqrt(params["v2"] + BN_EPS)
    h = h * params["g2"] + params["be2"]
    h = jnp.maximum(h, 0.0)
    logits = h @ params["w3"] + params["b3"]
    return jax.nn.softmax(logits, axis=1)


def init_params(key):
    """Deterministic parameter init mirroring nn.Linear / nn.BatchNorm1d shapes."""
    ks = jax.random.split(key, 10)

    def linear(kw, kb, fan_in, fan_out):
        bound = 1.0 / jnp.sqrt(float(fan_in))
        w = jax.random.uniform(kw, (fan_in, fan_out), jnp.float32, -bound, bound)
        b = jax.random.uniform(kb, (1, fan_out), jnp.float32, -bound, bound)
        return w, b

    w1, b1 = linear(ks[0], ks[1], IN_FEAT, H1)
    w2, b2 = linear(ks[2], ks[3], H1, H2)
    w3, b3 = linear(ks[4], ks[5], H2, NUM_CLASSES)

    # BatchNorm1d (eval mode uses running stats); non-trivial values so the
    # folded normalization math is exercised.
    g1 = jnp.ones((1, H1), jnp.float32)
    be1 = jnp.zeros((1, H1), jnp.float32)
    m1 = 0.1 * jax.random.normal(ks[6], (1, H1), jnp.float32)
    v1 = 1.0 + 0.1 * jnp.abs(jax.random.normal(ks[7], (1, H1), jnp.float32))

    g2 = jnp.ones((1, H2), jnp.float32)
    be2 = jnp.zeros((1, H2), jnp.float32)
    m2 = 0.1 * jax.random.normal(ks[8], (1, H2), jnp.float32)
    v2 = 1.0 + 0.1 * jnp.abs(jax.random.normal(ks[9], (1, H2), jnp.float32))

    return dict(w1=w1, b1=b1, g1=g1, be1=be1, m1=m1, v1=v1,
                w2=w2, b2=b2, g2=g2, be2=be2, m2=m2, v2=v2,
                w3=w3, b3=b3)


if __name__ == "__main__":
    # TODO(synk): training-mode paths (random input-noise branch, dropout,
    # BatchNorm batch statistics) are inference-mode identities here.
    key = jax.random.PRNGKey(0)
    k_x, k_p = jax.random.split(key)

    B = 16
    x = jax.random.normal(k_x, (B, 1, 4, 4), jnp.float32)   # NCHW, flattens to 16 feats
    params = init_params(k_p)

    out = jax.block_until_ready(simple_mlp_forward(x, params))

    assert out.shape == (B, NUM_CLASSES)
    # softmax rows must sum to 1 (exact division in-kernel)
    assert jnp.allclose(jnp.sum(out, axis=1), 1.0, atol=1e-3)
    # match the pure-f32 reference (bf16 weights/activations -> small deviation)
    ref = simple_mlp_reference(x, params)
    assert jnp.allclose(out, ref, atol=2e-2), float(jnp.max(jnp.abs(out - ref)))

    print("KERNEL_OK")
</pallas_src>

<mosaic_0001>
module attributes {stable_mosaic.version = 11 : i64} {
  func.func @_mlp_kernel(%arg0: i32, %arg1: memref<16x16xf32, #tpu.memory_space<vmem>>, %arg2: memref<80x40xbf16, #tpu.memory_space<vmem>>, %arg3: memref<8x40xf32, #tpu.memory_space<vmem>>, %arg4: memref<16x10xf32, #tpu.memory_space<vmem>>) attributes {dimension_semantics = [#tpu.dimension_semantics<parallel>], iteration_bounds = array<i64: 1>, scalar_prefetch = 0 : i64, scratch_operands = 0 : i64, tpu.core_type = #tpu.core_type<tc>, window_params = [{transform_indices = @transform_0, window_bounds = array<i64: 16, 16>}, {pipeline_mode = #tpu.pipeline_mode<synchronous>, transform_indices = @transform_1, window_bounds = array<i64: 80, 40>}, {pipeline_mode = #tpu.pipeline_mode<synchronous>, transform_indices = @transform_2, window_bounds = array<i64: 8, 40>}, {transform_indices = @transform_3, window_bounds = array<i64: 16, 10>}]} {
    %c0 = arith.constant 0 : index
    %c0_0 = arith.constant 0 : index
    %0 = vector.load %arg1[%c0, %c0_0] : memref<16x16xf32, #tpu.memory_space<vmem>>, vector<16x16xf32>
    %1 = arith.truncf %0 : vector<16x16xf32> to vector<16x16xbf16>
    %c0_1 = arith.constant 0 : index
    %c0_2 = arith.constant 0 : index
    %2 = vector.load %arg2[%c0_1, %c0_2] : memref<80x40xbf16, #tpu.memory_space<vmem>>, vector<16x40xbf16>
    %c16 = arith.constant 16 : index
    %c0_3 = arith.constant 0 : index
    %3 = vector.load %arg2[%c16, %c0_3] : memref<80x40xbf16, #tpu.memory_space<vmem>>, vector<40x20xbf16>
    %c56 = arith.constant 56 : index
    %c0_4 = arith.constant 0 : index
    %4 = vector.load %arg2[%c56, %c0_4] : memref<80x40xbf16, #tpu.memory_space<vmem>>, vector<20x10xbf16>
    %c0_5 = arith.constant 0 : index
    %c0_6 = arith.constant 0 : index
    %5 = vector.load %arg3[%c0_5, %c0_6] : memref<8x40xf32, #tpu.memory_space<vmem>>, vector<1x40xf32>
    %c1 = arith.constant 1 : index
    %c0_7 = arith.constant 0 : index
    %6 = vector.load %arg3[%c1, %c0_7] : memref<8x40xf32, #tpu.memory_space<vmem>>, vector<1x20xf32>
    %c2 = arith.constant 2 : index
    %c0_8 = arith.constant 0 : index
    %7 = vector.load %arg3[%c2, %c0_8] : memref<8x40xf32, #tpu.memory_space<vmem>>, vector<1x10xf32>
    %cst = arith.constant dense<0.000000e+00> : vector<16x40xf32>
    %8 = tpu.matmul %1, %2, %cst {dimension_numbers = #tpu.dot_dimension_numbers<[1], [0], [0], [1], [0, 0, 1, 1], [], []>} : vector<16x16xbf16>, vector<16x40xbf16>, vector<16x40xf32> -> vector<16x40xf32>
    %9 = vector.broadcast %5 : vector<1x40xf32> to vector<16x40xf32>
    %10 = arith.addf %8, %9 : vector<16x40xf32>
    %cst_9 = arith.constant 0.000000e+00 : f32
    %11 = vector.broadcast %cst_9 : f32 to vector<16x40xf32>
    %12 = arith.maximumf %10, %11 : vector<16x40xf32>
    %13 = arith.truncf %12 : vector<16x40xf32> to vector<16x40xbf16>
    %cst_10 = arith.constant dense<0.000000e+00> : vector<16x20xf32>
    %14 = tpu.matmul %13, %3, %cst_10 {dimension_numbers = #tpu.dot_dimension_numbers<[1], [0], [0], [1], [0, 0, 1, 1], [], []>} : vector<16x40xbf16>, vector<40x20xbf16>, vector<16x20xf32> -> vector<16x20xf32>
    %15 = vector.broadcast %6 : vector<1x20xf32> to vector<16x20xf32>
    %16 = arith.addf %14, %15 : vector<16x20xf32>
    %cst_11 = arith.constant 0.000000e+00 : f32
    %17 = vector.broadcast %cst_11 : f32 to vector<16x20xf32>
    %18 = arith.maximumf %16, %17 : vector<16x20xf32>
    %19 = arith.truncf %18 : vector<16x20xf32> to vector<16x20xbf16>
    %cst_12 = arith.constant dense<0.000000e+00> : vector<16x10xf32>
    %20 = tpu.matmul %19, %4, %cst_12 {dimension_numbers = #tpu.dot_dimension_numbers<[1], [0], [0], [1], [0, 0, 1, 1], [], []>} : vector<16x20xbf16>, vector<20x10xbf16>, vector<16x10xf32> -> vector<16x10xf32>
    %21 = vector.broadcast %7 : vector<1x10xf32> to vector<16x10xf32>
    %22 = arith.addf %20, %21 : vector<16x10xf32>
    %cst_13 = arith.constant dense<0xFF800000> : vector<16xf32>
    %23 = vector.multi_reduction <maximumf>, %22, %cst_13 [1] : vector<16x10xf32> to vector<16xf32>
    %24 = vector.shape_cast %23 : vector<16xf32> to vector<16x1xf32>
    %25 = vector.broadcast %24 : vector<16x1xf32> to vector<16x10xf32>
    %26 = arith.subf %22, %25 : vector<16x10xf32>
    %27 = math.exp %26 : vector<16x10xf32>
    %cst_14 = arith.constant dense<0.000000e+00> : vector<16xf32>
    %28 = vector.multi_reduction <add>, %27, %cst_14 [1] : vector<16x10xf32> to vector<16xf32>
    %29 = vector.shape_cast %28 : vector<16xf32> to vector<16x1xf32>
    %30 = vector.broadcast %29 : vector<16x1xf32> to vector<16x10xf32>
    %31 = arith.divf %27, %30 : vector<16x10xf32>
    %c0_15 = arith.constant 0 : index
    %c0_16 = arith.constant 0 : index
    %32 = vector.load %arg4[%c0_15, %c0_16] : memref<16x10xf32, #tpu.memory_space<vmem>>, vector<16x10xf32>
    tpu.vector_store %arg4[%c0_15, %c0_16], %31 {strides = array<i32>} : memref<16x10xf32, #tpu.memory_space<vmem>>, vector<16x10xf32>,
    return
  }
  func.func @transform_0(%arg0: i32) -> (i32, i32) {
    %c0_i32 = arith.constant 0 : i32
    %c0_i32_0 = arith.constant 0 : i32
    return %arg0, %c0_i32 : i32, i32
  }
  func.func @transform_1(%arg0: i32) -> (i32, i32) {
    %c0_i32 = arith.constant 0 : i32
    %c0_i32_0 = arith.constant 0 : i32
    %c0_i32_1 = arith.constant 0 : i32
    return %c0_i32, %c0_i32_0 : i32, i32
  }
  func.func @transform_2(%arg0: i32) -> (i32, i32) {
    %c0_i32 = arith.constant 0 : i32
    %c0_i32_0 = arith.constant 0 : i32
    %c0_i32_1 = arith.constant 0 : i32
    return %c0_i32, %c0_i32_0 : i32, i32
  }
  func.func @transform_3(%arg0: i32) -> (i32, i32) {
    %c0_i32 = arith.constant 0 : i32
    %c0_i32_0 = arith.constant 0 : i32
    return %arg0, %c0_i32 : i32, i32
  }
}

</mosaic_0001>

<bundles_post_ra>
// kernel: tpu_custom_call.1
= control target key start
LH: loop header
LB: loop body
LE: loop exit
PB: predicated region body
PF: predicated region fallthrough
CT: control target
= control target key end

     0   :  { %vm39_vm0 = vcmask 130048   ;;  %s330_s0 = inlined_call_operand.vmem [shape: f32[16,16], index: 0, kind: input, shape index: {}]   ;;  %s331_s1 = inlined_call_operand.vmem [shape: bf16[80,40], index: 1, kind: input, shape index: {}]   ;;  %s332_s2 = inlined_call_operand.vmem [shape: f32[8,40], index: 2, kind: input, shape index: {}]   ;;  %s333_s3 = inlined_call_operand.hbm [shape: f32[16,10], index: 3, kind: output, shape index: {}]  }
   0x1   :  { %v221_v0 = vld [vmem:[%s331_s1] sm:$0xff]  ;;  %v17_v2 = vld [vmem:[%s330_s0 + $0x8] sm:$0xff] }
   0x2   :  { %v16_v1 = vld [vmem:[%s330_s0] sm:$0xff]  ;;  %50 = vmatpush.bf16.msra.mxu0 %v221_v0 }
   0x3   :  { %v18_v3 = vpack.c.bf16 %v17_v2, %v16_v1 }
   0x4   :  { %8 = vsyncpa [#allocation3], 0  ;;  %v25_v4 = vld [vmem:[%s331_s1 + $0x18] sm:$0xf]  ;;  %vm80_vm1 = vcmask 1043456   ;;  %v223_v8 = vld [vmem:[%s331_s1 + $0x10] sm:$0xff] }
   0x5   :  { %206 = vmatmul.msk.bf16.vlgmr.msra.gmra.mxu0 %vm39_vm0, %v18_v3  ;;  %v70_v5 = vunpack.c.l.b16 %v25_v4  ;;  %v222_v9 = vld [vmem:[%s331_s1 + $0x8] sm:$0xff]  ;;  %v228_v11 = vld [vmem:[%s332_s2] ss:$0 sm:$0xff]  ;;  %vm76_vm2 = vcmask 326656   ;;  %v28_v18 = vld [vmem:[%s331_s1 + $0x24] sm:$0x3] }
   0x6   :  { %v107_v19 = vunpack.c.l.b16 %v28_v18  ;;  %vm115_vm3 = vcmask 1041408   ;;  %v224_v22 = vld [vmem:[%s331_s1 + $0x1c] sm:$0xff]  ;;  %vm111_vm4 = vcmask 162816   ;;  %vm133_vm5 = vcmask 80896   ;;  %s265_s1 = smov [#allocation2]   ;;  %s190_s8 = sshll.u32 %s333_s3, 4  ;;  %s191_s8 = int_to_ptr.hbm [resolvable:$true] %s190_s8 }
   0x7   :  { %v73_v6 = vpack.c.b16 %v70_v5, %v70_v5  ;;  %v229_v24 = vld [vmem:[%s332_s2 + $0x1] ss:$0 sm:$0xff]  ;;  %v230_v31 = vld [vmem:[%s332_s2 + $0x2] ss:$0 sm:$0xff]  ;;  %s188_s2 = sshll.u32 %s265_s1, 4  ;;  %s266_s9 = smov 128   ;;  %s189_s2 = int_to_ptr.vmem [resolvable:$true] %s188_s2 }
   0x8   :  { %v109_v20 = vpack.c.b16 %v107_v19, %v107_v19  ;;  %s267_s10 = smov 8  }
   0x9   :  { %v82_v7 = vsel %vm80_vm1, %v73_v6, 0 }
   0xa   :  { %89 = vmatpush.bf16.msra.mxu1 %v82_v7  ;;  %v117_v21 = vsel %vm115_vm3, %v109_v20, 0 }
   0xb   :  { %125 = vmatpush.bf16.msra.mxu2 %v117_v21 }
   0xe   :  { %90 = vmatpush.bf16.msra.mxu1 %v223_v8 }
   0xf   :  { %126 = vmatpush.bf16.msra.mxu2 %v224_v22 }
  0x12   :  { %91 = vmatpush.bf16.msra.mxu1 %v222_v9 }
  0x82   :  { %v52_v10 = vpop.f32.mrf.mxu0 }
  0x83   :  { %v53_v12 = vadd.f32 %v228_v11, %v52_v10 }
  0x85   :  { %v57_v15 = vmax.f32 %v53_v12, 0.0 }
  0x8a   :  { %v54_v13 = vpop.f32.mrf.mxu0 }
  0x8b   :  { %v55_v14 = vadd.f32 %v228_v11, %v54_v13 }
  0x8d   :  { %v58_v16 = vmax.f32 %v55_v14, 0.0 }
  0x8f   :  { %v59_v17 = vpack.c.bf16 %v58_v16, %v57_v15 }
  0x91   :  { %215 = vmatmul.msk.bf16.vlgmr.msra.gmra.mxu1 %vm76_vm2, %v59_v17 }
 0x10e   :  { %v93_v23 = vpop.f32.mrf.mxu1 }
 0x10f   :  { %v94_v25 = vadd.f32 %v229_v24, %v93_v23 }
 0x111   :  { %v98_v28 = vmax.f32 %v94_v25, 0.0 }
 0x116   :  { %v95_v26 = vpop.f32.mrf.mxu1 }
 0x117   :  { %v96_v27 = vadd.f32 %v229_v24, %v95_v26 }
 0x119   :  { %v99_v29 = vmax.f32 %v96_v27, 0.0 }
 0x11b   :  { %v100_v30 = vpack.c.bf16 %v99_v29, %v98_v28 }
 0x11d   :  { %220 = vmatmul.msk.bf16.vlgmr.msra.gmra.mxu2 %vm111_vm4, %v100_v30 }
 0x1a0   :  { %v128_v32 = vpop.f32.mrf.mxu2 }
 0x1a1   :  { %v129_v33 = vadd.f32 %v230_v31, %v128_v32 }
 0x1a3   :  { %v134_v34 = vsel %vm133_vm5, %v129_v33, -inf }
 0x1a4   :  { %135 = vmax.xlane.f32.xlu0 %v134_v34 }
 0x1a8   :  { %v130_v35 = vpop.f32.mrf.mxu2 }
 0x1a9   :  { %v131_v36 = vadd.f32 %v230_v31, %v130_v35 }
 0x1ab   :  { %v137_v37 = vsel %vm133_vm5, %v131_v36, -inf }
 0x1ac   :  { %138 = vmax.xlane.f32.xlu0 %v137_v37 }
 0x217   :  { %v136_v38 = vpop.xlane.xlu0 %135 }
 0x218   :  { %v140_v39 = vsub.f32 %v129_v33, %v136_v38 }
 0x21a   :  { %v142_v40 = vmul.f32 1.442695, %v140_v39 }
 0x21c   :  { %231 = vpow2.f32 %v142_v40 }
 0x21f   :  { %v139_v41 = vpop.xlane.xlu0 %138 }
 0x220   :  { %v141_v42 = vsub.f32 %v131_v36, %v139_v41 }
 0x222   :  { %v232_v43 = vpop.eup %231  ;;  %v144_v44 = vmul.f32 1.442695, %v141_v42 }
 0x223   :  { %v146_v45 = vsel %vm133_vm5, %v232_v43, 0.0 }
 0x224   :  { %233 = vpow2.f32 %v144_v44  ;;  %147 = vadd.xlane.f32.xlu1 %v146_v45 }
 0x22a   :  { %v234_v46 = vpop.eup %233 }
 0x22b   :  { %v149_v47 = vsel %vm133_vm5, %v234_v46, 0.0 }
 0x22c   :  { %150 = vadd.xlane.f32.xlu1 %v149_v47 }
 0x297   :  { %v148_v48 = vpop.xlane.xlu1 %147 }
 0x298   :  { %235 = vrcp.f32 %v148_v48  ;;  %v163_v53 = vand.u32 2147483648, %v148_v48  ;;  %v161_v55 = vand.u32 2147483647, %v148_v48  ;;  %vm157_vm7 = vweird.f32 %v148_v48 }
 0x29a   :  { %v164_v58 = vor.u32 1.1754944e-38, %v163_v53  ;;  %vm162_vm9 = vcmp.eq.f32.partialorder %v161_v55, 8.507059e+37 }
 0x29e   :  { %v236_v49 = vpop.eup %235 }
 0x29f   :  { %v153_v50 = vmul.f32 %v236_v49, %v148_v48  ;;  %v151_v51 = vpop.xlane.xlu1 %150  ;;  %vm158_vm6 = vweird.f32 %v236_v49 }
 0x2a0   :  { %237 = vrcp.f32 %v151_v51  ;;  %vm159_vm8 = vmor %vm157_vm7, %vm158_vm6  ;;  %v178_v0 = vand.u32 2147483648, %v151_v51  ;;  %v176_v2 = vand.u32 2147483647, %v151_v51  ;;  %vm172_vm11 = vweird.f32 %v151_v51 }
 0x2a1   :  { %v154_v52 = vsub.f32 1.0, %v153_v50 }
 0x2a2   :  { %v179_v4 = vor.u32 1.1754944e-38, %v178_v0  ;;  %vm177_vm13 = vcmp.eq.f32.partialorder %v176_v2, 8.507059e+37 }
 0x2a3   :  { %v155_v54 = vmul.f32 %v236_v49, %v154_v52 }
 0x2a5   :  { %v156_v56 = vadd.f32 %v236_v49, %v155_v54 }
 0x2a6   :  { %v238_v57 = vpop.eup %237 }
 0x2a7   :  { %v160_v59 = vsel %vm159_vm8, %v236_v49, %v156_v56  ;;  %v168_v60 = vmul.f32 %v238_v57, %v151_v51  ;;  %vm173_vm10 = vweird.f32 %v238_v57 }
 0x2a8   :  { %v165_v61 = vsel %vm162_vm9, %v164_v58, %v160_v59  ;;  %vm174_vm12 = vmor %vm172_vm11, %vm173_vm10 }
 0x2a9   :  { %v166_v62 = vmul.f32 %v232_v43, %v165_v61  ;;  %v169_v63 = vsub.f32 1.0, %v168_v60 }
 0x2ab   :  { %182 = vst.msk [vmem:[#allocation2] sm:$0xff] %vm133_vm5, %v166_v62  ;;  %v170_v1 = vmul.f32 %v238_v57, %v169_v63 }
 0x2ad   :  { %v171_v3 = vadd.f32 %v238_v57, %v170_v1 }
 0x2af   :  { %v175_v5 = vsel %vm174_vm12, %v238_v57, %v171_v3 }
 0x2b0   :  { %v180_v6 = vsel %vm177_vm13, %v179_v4, %v175_v5 }
 0x2b1   :  { %v181_v7 = vmul.f32 %v234_v46, %v180_v6 }
 0x2b3   :  { %183 = vst.msk [vmem:[#allocation2 + $0x8] sm:$0xff] %vm133_vm5, %v181_v7 }
 0x2b4   :  { %196 = dma.vmem_to_hbm [thread:$0]  %s189_s2, 256, %s191_s8, [#allocation3], %s266_s9, %s266_s9, %s267_s10  }
 0x2b5   :  { %263 = dma.done.wait [#allocation3], 256  }
 0x2b6   :  { %264 = vsyncadd [#allocation3], 4294967040 }
 0x2b7   :  { %201 = vsyncpa [#allocation3], 1 }

</bundles_post_ra>
